<compile_context>
chip_gen: v6e
topology: v6e:2x2x1
jax: 0.10.0
libtpu: 0.0.40
codegen_flags: <defaults>
</compile_context>

<pallas_src>
import jax
import jax.numpy as jnp
from jax.experimental import pallas as pl
from jax.experimental.pallas import tpu as pltpu


def _se_kernel(x_ref, w1_ref, w2_ref, o_ref):
    """One (Bt, C, HW) block: squeeze -> tiny MLP on the VPU -> scale.

    x_ref : (Bt, C, HW)  activation tile (f32 or bf16; reductions in f32)
    w1_ref: (Cr, C)      fc1 weight, PyTorch (out, in) layout -> C on lanes
    w2_ref: (Cr, C)      fc2 weight transposed                -> C on lanes
    o_ref : (Bt, C, HW)  output tile
    """
    # --- squeeze: global average pool over the spatial (lane) axis, f32 acc.
    y = jnp.mean(x_ref[...].astype(jnp.float32), axis=-1)            # (Bt, C)

    # --- excitation MLP on the VPU: Cr = C // reduction is tiny, so two
    #     broadcast-multiply-reduce passes beat a degenerate MXU matmul.
    w1 = w1_ref[...].astype(jnp.float32)                              # (Cr, C)
    w2 = w2_ref[...].astype(jnp.float32)                              # (Cr, C)
    h = jnp.sum(y[:, None, :] * w1[None, :, :], axis=-1)              # (Bt, Cr)
    h = jnp.maximum(h, 0.0)                                           # ReLU
    s = jax.nn.sigmoid(jnp.sum(h[:, :, None] * w2[None, :, :], axis=1))  # (Bt, C)

    # --- scale: re-read x from VMEM (no big live range across the MLP).
    #     Multiply in the activation dtype: gate cast once, lane-dense store.
    #     For f32 activations this is exact f32 math; for bf16 it halves the
    #     VALU / vreg cost of the hot pass (accuracy within bf16 tolerance).
    o_ref[...] = x_ref[...] * s.astype(o_ref.dtype)[:, :, None]


def _choose_batch_tile(B, C, HW, itemsize):
    """Pick the batch-tile size from the REAL live-VMEM footprint.

    Live VMEM ~= 2x (double-buffered input block) + 2x (double-buffered output
    block) = 4 blocks, plus tiny weights.  Target <= ~12 MiB total so the
    kernel fits v5e's 16 MiB scoped default and leaves headroom on v6e/v7x.
    """
    row_bytes = C * HW * itemsize
    target_live_bytes = 12 * 1024 * 1024
    n_live_blocks = 4                         # 2x in + 2x out (default Buffered(2))
    max_bt = max(1, target_live_bytes // (n_live_blocks * row_bytes))
    bt = min(B, max_bt)
    # Split into >= 2 grid steps only when each half still carries >= 1 MiB of
    # block data (worthwhile for v7x 2-TC sharding); on single-TC v5e/v6e and
    # on tiny shapes the extra sequential step is pure per-step overhead.
    if B >= 2 and (B // 2) * row_bytes >= (1 << 20):
        bt = min(bt, max(1, B // 2))
    return bt


@jax.jit
def se_block(x, w1, w2):
    """Squeeze-and-Excitation forward.

    x : (B, C, H, W)   activations (float32 or bfloat16)
    w1: (C//r, C)      fc1.weight  (PyTorch (out, in) layout, bias-free)
    w2: (C, C//r)      fc2.weight  (PyTorch (out, in) layout, bias-free)
    """
    B, C, H, W = x.shape
    Cr = w1.shape[0]
    HW = H * W
    x3 = x.reshape(B, C, HW)
    w2t = w2.T                      # (Cr, C): lane-major over C inside kernel

    itemsize = x.dtype.itemsize
    bt = _choose_batch_tile(B, C, HW, itemsize)
    grid = (pl.cdiv(B, bt),)        # ragged last batch block is masked by Pallas

    # Explicit VMEM limit derived from the actual block size:
    #   4 live activation blocks + double-buffered weights + scratch slack.
    # Floor at the v5e 16 MiB default; cap at 48 MiB so tiles never outgrow
    # v7x's 64 MiB physical VMEM.
    block_bytes = bt * C * HW * itemsize
    w_bytes = (w1.size + w2.size) * w1.dtype.itemsize
    vmem_limit = 4 * block_bytes + 4 * w_bytes + (2 << 20)
    vmem_limit = int(min(max(vmem_limit, 16 << 20), 48 << 20))

    # Bandwidth-bound cost hint for XLA's scheduler.
    cost = pl.CostEstimate(
        flops=3 * B * C * HW + 4 * B * C * Cr,
        transcendentals=B * C,
        bytes_accessed=2 * B * C * HW * itemsize + 2 * w_bytes,
    )

    out3 = pl.pallas_call(
        _se_kernel,
        out_shape=jax.ShapeDtypeStruct((B, C, HW), x.dtype),
        grid_spec=pltpu.PrefetchScalarGridSpec(
            num_scalar_prefetch=0,
            grid=grid,
            in_specs=[
                pl.BlockSpec((bt, C, HW), lambda b: (b, 0, 0)),   # batch tile
                pl.BlockSpec((Cr, C), lambda b: (0, 0)),          # VMEM-resident
                pl.BlockSpec((Cr, C), lambda b: (0, 0)),          # VMEM-resident
            ],
            out_specs=pl.BlockSpec((bt, C, HW), lambda b: (b, 0, 0)),
        ),
        compiler_params=pltpu.CompilerParams(
            dimension_semantics=("parallel",),
            vmem_limit_bytes=vmem_limit),
        cost_estimate=cost,
    )(x3, w1, w2t)
    return out3.reshape(B, C, H, W)


def se_block_ref(x, w1, w2):
    """Plain-JAX reference mirroring the PyTorch forward (weights in (out, in))."""
    y = jnp.mean(x, axis=(2, 3))                 # (B, C)
    h = jnp.maximum(y @ w1.T, 0.0)               # (B, C//r)
    s = jax.nn.sigmoid(h @ w2.T)                 # (B, C)
    return x * s[:, :, None, None]


if __name__ == "__main__":
    # Module config: in_channels=32, reduction=16 -> hidden Cr = 2
    B, C, H, W = 2, 32, 16, 16
    reduction = 16
    Cr = C // reduction

    key = jax.random.PRNGKey(0)
    kx, k1, k2 = jax.random.split(key, 3)

    x = jax.random.normal(kx, (B, C, H, W), dtype=jnp.float32)
    # PyTorch nn.Linear weight layout: (out_features, in_features).
    w1 = jax.random.normal(k1, (Cr, C), dtype=jnp.float32) * (1.0 / jnp.sqrt(C))
    w2 = jax.random.normal(k2, (C, Cr), dtype=jnp.float32) * (1.0 / jnp.sqrt(Cr))

    # --- float32 path: strict check against the plain-JAX reference.
    out = jax.block_until_ready(se_block(x, w1, w2))
    ref = se_block_ref(x, w1, w2)
    assert out.shape == (B, C, H, W)
    assert jnp.allclose(out, ref, atol=1e-5, rtol=1e-5), "f32 mismatch vs reference"

    # --- odd batch (exercises the ragged last block / cdiv grid path).
    x_odd = jax.random.normal(kx, (3, C, H, W), dtype=jnp.float32)
    out_odd = jax.block_until_ready(se_block(x_odd, w1, w2))
    ref_odd = se_block_ref(x_odd, w1, w2)
    assert jnp.allclose(out_odd, ref_odd, atol=1e-5, rtol=1e-5), "ragged-B mismatch"

    # --- bfloat16 activations (halves HBM traffic; squeeze/MLP stay in f32).
    x_bf = x.astype(jnp.bfloat16)
    out_bf = jax.block_until_ready(se_block(x_bf, w1, w2))
    ref_bf = se_block_ref(x_bf.astype(jnp.float32), w1, w2)
    assert out_bf.dtype == jnp.bfloat16
    assert jnp.allclose(out_bf.astype(jnp.float32), ref_bf, atol=2e-2, rtol=2e-2), \
        "bf16 mismatch vs reference"

    print("KERNEL_OK")
</pallas_src>

<mosaic_0001>
module attributes {stable_mosaic.version = 11 : i64} {
  func.func @_se_kernel(%arg0: i32, %arg1: memref<2x32x256xf32, #tpu.memory_space<vmem>>, %arg2: memref<2x32xf32, #tpu.memory_space<vmem>>, %arg3: memref<2x32xf32, #tpu.memory_space<vmem>>, %arg4: memref<2x32x256xf32, #tpu.memory_space<vmem>>) attributes {dimension_semantics = [#tpu.dimension_semantics<parallel>], iteration_bounds = array<i64: 1>, scalar_prefetch = 0 : i64, scratch_operands = 0 : i64, tpu.core_type = #tpu.core_type<tc>, window_params = [{transform_indices = @transform_0, window_bounds = array<i64: 2, 32, 256>}, {pipeline_mode = #tpu.pipeline_mode<synchronous>, transform_indices = @transform_1, window_bounds = array<i64: 2, 32>}, {pipeline_mode = #tpu.pipeline_mode<synchronous>, transform_indices = @transform_2, window_bounds = array<i64: 2, 32>}, {transform_indices = @transform_3, window_bounds = array<i64: 2, 32, 256>}]} {
    %c0 = arith.constant 0 : index
    %c0_0 = arith.constant 0 : index
    %c0_1 = arith.constant 0 : index
    %0 = vector.load %arg1[%c0, %c0_0, %c0_1] : memref<2x32x256xf32, #tpu.memory_space<vmem>>, vector<2x32x256xf32>
    %cst = arith.constant dense<0.000000e+00> : vector<2x32xf32>
    %1 = vector.multi_reduction <add>, %0, %cst [2] : vector<2x32x256xf32> to vector<2x32xf32>
    %cst_2 = arith.constant 2.560000e+02 : f32
    %2 = vector.broadcast %cst_2 : f32 to vector<2x32xf32>
    %3 = arith.divf %1, %2 : vector<2x32xf32>
    %c0_3 = arith.constant 0 : index
    %c0_4 = arith.constant 0 : index
    %4 = vector.load %arg2[%c0_3, %c0_4] : memref<2x32xf32, #tpu.memory_space<vmem>>, vector<2x32xf32>
    %c0_5 = arith.constant 0 : index
    %c0_6 = arith.constant 0 : index
    %5 = vector.load %arg3[%c0_5, %c0_6] : memref<2x32xf32, #tpu.memory_space<vmem>>, vector<2x32xf32>
    %6 = vector.shape_cast %3 : vector<2x32xf32> to vector<2x1x32xf32>
    %7 = vector.shape_cast %4 : vector<2x32xf32> to vector<1x2x32xf32>
    %8 = vector.broadcast %6 : vector<2x1x32xf32> to vector<2x2x32xf32>
    %9 = vector.broadcast %7 : vector<1x2x32xf32> to vector<2x2x32xf32>
    %10 = arith.mulf %8, %9 : vector<2x2x32xf32>
    %cst_7 = arith.constant dense<0.000000e+00> : vector<2x2xf32>
    %11 = vector.multi_reduction <add>, %10, %cst_7 [2] : vector<2x2x32xf32> to vector<2x2xf32>
    %cst_8 = arith.constant 0.000000e+00 : f32
    %12 = vector.broadcast %cst_8 : f32 to vector<2x2xf32>
    %13 = arith.maximumf %11, %12 : vector<2x2xf32>
    %14 = vector.shape_cast %13 : vector<2x2xf32> to vector<2x2x1xf32>
    %15 = vector.shape_cast %5 : vector<2x32xf32> to vector<1x2x32xf32>
    %16 = vector.broadcast %14 : vector<2x2x1xf32> to vector<2x2x32xf32>
    %17 = vector.broadcast %15 : vector<1x2x32xf32> to vector<2x2x32xf32>
    %18 = arith.mulf %16, %17 : vector<2x2x32xf32>
    %cst_9 = arith.constant dense<0.000000e+00> : vector<2x32xf32>
    %19 = vector.multi_reduction <add>, %18, %cst_9 [1] : vector<2x2x32xf32> to vector<2x32xf32>
    %20 = arith.negf %19 : vector<2x32xf32>
    %21 = math.exp %20 : vector<2x32xf32>
    %cst_10 = arith.constant 1.000000e+00 : f32
    %22 = vector.broadcast %cst_10 : f32 to vector<2x32xf32>
    %23 = arith.addf %22, %21 : vector<2x32xf32>
    %24 = arith.divf %22, %23 : vector<2x32xf32>
    %c0_11 = arith.constant 0 : index
    %c0_12 = arith.constant 0 : index
    %c0_13 = arith.constant 0 : index
    %25 = vector.load %arg1[%c0_11, %c0_12, %c0_13] : memref<2x32x256xf32, #tpu.memory_space<vmem>>, vector<2x32x256xf32>
    %26 = vector.shape_cast %24 : vector<2x32xf32> to vector<2x32x1xf32>
    %27 = vector.broadcast %26 : vector<2x32x1xf32> to vector<2x32x256xf32>
    %28 = arith.mulf %25, %27 : vector<2x32x256xf32>
    %c0_14 = arith.constant 0 : index
    %c0_15 = arith.constant 0 : index
    %c0_16 = arith.constant 0 : index
    %29 = vector.load %arg4[%c0_14, %c0_15, %c0_16] : memref<2x32x256xf32, #tpu.memory_space<vmem>>, vector<2x32x256xf32>
    tpu.vector_store %arg4[%c0_14, %c0_15, %c0_16], %28 {strides = array<i32>} : memref<2x32x256xf32, #tpu.memory_space<vmem>>, vector<2x32x256xf32>,
    return
  }
  func.func @transform_0(%arg0: i32) -> (i32, i32, i32) {
    %c0_i32 = arith.constant 0 : i32
    %c0_i32_0 = arith.constant 0 : i32
    %c0_i32_1 = arith.constant 0 : i32
    return %arg0, %c0_i32, %c0_i32_0 : i32, i32, i32
  }
  func.func @transform_1(%arg0: i32) -> (i32, i32) {
    %c0_i32 = arith.constant 0 : i32
    %c0_i32_0 = arith.constant 0 : i32
    %c0_i32_1 = arith.constant 0 : i32
    return %c0_i32, %c0_i32_0 : i32, i32
  }
  func.func @transform_2(%arg0: i32) -> (i32, i32) {
    %c0_i32 = arith.constant 0 : i32
    %c0_i32_0 = arith.constant 0 : i32
    %c0_i32_1 = arith.constant 0 : i32
    return %c0_i32, %c0_i32_0 : i32, i32
  }
  func.func @transform_3(%arg0: i32) -> (i32, i32, i32) {
    %c0_i32 = arith.constant 0 : i32
    %c0_i32_0 = arith.constant 0 : i32
    %c0_i32_1 = arith.constant 0 : i32
    return %arg0, %c0_i32, %c0_i32_0 : i32, i32, i32
  }
}

</mosaic_0001>

<bundles_post_ra>
// kernel: se_block.1
= control target key start
LH: loop header
LB: loop body
LE: loop exit
PB: predicated region body
PF: predicated region fallthrough
CT: control target
= control target key end

     0   :  { %v66_v24 = vlaneseq  ;;  %v397_v30 = vmov 0   ;;  %vm203_vm0 = vcmask 130112   ;;  %vm210_vm1 = vcmask 195712   ;;  %s612_s0 = inlined_call_operand.vmem [shape: f32[2,32,256], index: 0, kind: input, shape index: {}]   ;;  %s613_s1 = inlined_call_operand.vmem [shape: f32[2,32], index: 1, kind: input, shape index: {}]   ;;  %s614_s2 = inlined_call_operand.vmem [shape: f32[2,32], index: 2, kind: input, shape index: {}]   ;;  %s615_s3 = inlined_call_operand.vmem [shape: f32[2,32,256], index: 3, kind: output, shape index: {}]  }
   0x1   :  { %v421_v0 = vld [vmem:[%s612_s0 + $0x40] sm:$0xff]  ;;  %v426_v1 = vld [vmem:[%s612_s0 + $0x48] sm:$0xff]  ;;  %v443_v5 = vld [vmem:[%s612_s0 + $0x50] sm:$0xff]  ;;  %388 = vset.pattern.permute.xlu1 %v397_v30  ;;  %387 = vset.pattern.permute.xlu0 %v397_v30  ;;  %vm217_vm2 = vcmask 261312   ;;  %vm276_vm3 = vcmask 1041409   ;;  %vm281_vm4 = vcmask 254976  }
   0x2   :  { %v431_v2 = vld [vmem:[%s612_s0] sm:$0xff]  ;;  %v42_v3 = vadd.f32 %v426_v1, %v421_v0  ;;  %v438_v4 = vld [vmem:[%s612_s0 + $0x8] sm:$0xff]  ;;  %v448_v6 = vld [vmem:[%s612_s0 + $0x58] sm:$0xff]  ;;  %v515_v25 = vshrl.u32 %v66_v24, 7 }
   0x3   :  { %v30_v7 = vadd.f32 %v438_v4, %v431_v2  ;;  %v455_v8 = vld [vmem:[%s612_s0 + $0x10] sm:$0xff]  ;;  %v460_v9 = vld [vmem:[%s612_s0 + $0x18] sm:$0xff]  ;;  %v45_v10 = vadd.f32 %v448_v6, %v443_v5  ;;  %v469_v12 = vld [vmem:[%s612_s0 + $0x60] sm:$0xff] }
   0x4   :  { %43 = vadd.xlane.f32.xlu1 %v42_v3  ;;  %v33_v11 = vadd.f32 %v460_v9, %v455_v8  ;;  %v474_v13 = vld [vmem:[%s612_s0 + $0x68] sm:$0xff]  ;;  %v479_v14 = vld [vmem:[%s612_s0 + $0x20] sm:$0xff]  ;;  %v493_v18 = vld [vmem:[%s612_s0 + $0x70] sm:$0xff]  ;;  %v68_v26 = vsub.s32 0, %v515_v25  ;;  %v87_v29 = vsub.s32 1, %v515_v25 }
   0x5   :  { %31 = vadd.xlane.f32.xlu0 %v30_v7  ;;  %v484_v15 = vld [vmem:[%s612_s0 + $0x28] sm:$0xff]  ;;  %v48_v16 = vadd.f32 %v474_v13, %v469_v12  ;;  %v498_v19 = vld [vmem:[%s612_s0 + $0x78] sm:$0xff]  ;;  %v503_v20 = vld [vmem:[%s612_s0 + $0x30] sm:$0xff] }
   0x6   :  { %v36_v17 = vadd.f32 %v484_v15, %v479_v14  ;;  %v508_v21 = vld [vmem:[%s612_s0 + $0x38] sm:$0xff]  ;;  %v51_v22 = vadd.f32 %v498_v19, %v493_v18  ;;  %v63_v27 = vld [vmem:[%s613_s1] sm:$0x3] }
   0x7   :  { %v39_v23 = vadd.f32 %v508_v21, %v503_v20  ;;  %v69_v28 = vrot.slane %v63_v27, %v68_v26  ;;  %v88_v31 = vrot.slane %v63_v27, %v87_v29 }
   0x8   :  { %46 = vadd.xlane.f32.xlu1 %v45_v10 }
   0x9   :  { %34 = vadd.xlane.f32.xlu0 %v33_v11 }
   0xc   :  { %49 = vadd.xlane.f32.xlu1 %v48_v16 }
   0xd   :  { %37 = vadd.xlane.f32.xlu0 %v36_v17 }
  0x10   :  { %52 = vadd.xlane.f32.xlu1 %v51_v22 }
  0x11   :  { %40 = vadd.xlane.f32.xlu0 %v39_v23 }
  0x21   :  { %75 = vbcast.lane.b32.xlu1 %v69_v28, 264 }
  0x25   :  { %90 = vbcast.lane.b32.xlu1 %v88_v31, 256 }
  0x27   :  { %71 = vbcast.lane.b32.xlu0 %v69_v28, 256 }
  0x29   :  { %94 = vbcast.lane.b32.xlu1 %v88_v31, 264 }
  0x2b   :  { %79 = vbcast.lane.b32.xlu0 %v69_v28, 272 }
  0x2d   :  { %98 = vbcast.lane.b32.xlu1 %v88_v31, 272 }
  0x2f   :  { %83 = vbcast.lane.b32.xlu0 %v69_v28, 280 }
  0x31   :  { %102 = vbcast.lane.b32.xlu1 %v88_v31, 280  ;;  %v193_v31 = vand.u32 127, %v66_v24 }
  0x8d   :  { %v44_v32 = vpop.xlane.xlu1 %43 }
  0x8e   :  { %v32_v33 = vpop.xlane.xlu0 %31  ;;  %v59_v48 = vmul.f32 0.00390625, %v44_v32 }
  0x8f   :  { %v55_v41 = vmul.f32 0.00390625, %v32_v33 }
  0x91   :  { %v47_v34 = vpop.xlane.xlu1 %46 }
  0x92   :  { %v35_v35 = vpop.xlane.xlu0 %34  ;;  %v60_v52 = vmul.f32 0.00390625, %v47_v34  ;;  %v198_v34 = vadd.s32 4294967288, %v193_v31 }
  0x93   :  { %v56_v40 = vmul.f32 0.00390625, %v35_v35 }
  0x95   :  { %v50_v36 = vpop.xlane.xlu1 %49 }
  0x96   :  { %v38_v37 = vpop.xlane.xlu0 %37  ;;  %v61_v60 = vmul.f32 0.00390625, %v50_v36 }
  0x97   :  { %v57_v56 = vmul.f32 0.00390625, %v38_v37  ;;  %v205_v37 = vadd.s32 4294967280, %v193_v31 }
  0x99   :  { %v53_v38 = vpop.xlane.xlu1 %52 }
  0x9a   :  { %v41_v39 = vpop.xlane.xlu0 %40  ;;  %v62_v16 = vmul.f32 0.00390625, %v53_v38  ;;  %v212_v38 = vadd.s32 4294967272, %v193_v31 }
  0x9b   :  { %v58_v3 = vmul.f32 0.00390625, %v41_v39  ;;  %v201_v39 = vsub.s32 %v198_v34, %v515_v25  ;;  %v64_v34 = vld [vmem:[%s614_s2] sm:$0x3] }
  0x9d   :  { %v76_v42 = vpop.permute.xlu1 %75 }
  0x9e   :  { %v113_v43 = vmul.f32 %v76_v42, %v56_v40  ;;  %v72_v44 = vpop.permute.xlu0 %71  ;;  %v121_v53 = vmul.f32 %v76_v42, %v60_v52 }
  0x9f   :  { %v112_v45 = vmul.f32 %v72_v44, %v55_v41  ;;  %v120_v50 = vmul.f32 %v72_v44, %v59_v48  ;;  %v215_v44 = vsub.s32 %v212_v38, %v515_v25 }
  0xa0   :  { %148 = vperm.xlu1 %388, %v113_v43   ;;  %v208_v43 = vsub.s32 %v205_v37, %v515_v25 }
  0xa1   :  { %145 = vperm.xlu0 %387, %v112_v45   ;;  %v91_v46 = vpop.permute.xlu1 %90 }
  0xa2   :  { %v116_v47 = vmul.f32 %v91_v46, %v55_v41  ;;  %v124_v54 = vmul.f32 %v91_v46, %v59_v48  ;;  %v80_v55 = vpop.permute.xlu0 %79 }
  0xa3   :  { %v114_v57 = vmul.f32 %v80_v55, %v57_v56  ;;  %v122_v61 = vmul.f32 %v80_v55, %v61_v60 }
  0xa4   :  { %157 = vperm.xlu1 %388, %v116_v47  }
  0xa5   :  { %v95_v49 = vpop.permute.xlu1 %94 }
  0xa6   :  { %v117_v51 = vmul.f32 %v95_v49, %v56_v40  ;;  %v125_v58 = vmul.f32 %v95_v49, %v60_v52  ;;  %v84_v63 = vpop.permute.xlu0 %83  ;;  %v196_v40 = vsub.s32 %v193_v31, %v515_v25 }
  0xa7   :  { %v115_v7 = vmul.f32 %v84_v63, %v58_v3  ;;  %v123_v17 = vmul.f32 %v84_v63, %v62_v16 }
  0xa8   :  { %169 = vperm.xlu1 %388, %v120_v50   ;;  %160 = vperm.xlu0 %387, %v117_v51  }
  0xa9   :  { %v99_v59 = vpop.permute.xlu1 %98 }
  0xaa   :  { %v118_v62 = vmul.f32 %v99_v59, %v57_v56  ;;  %v126_v10 = vmul.f32 %v99_v59, %v61_v60 }
  0xac   :  { %181 = vperm.xlu1 %388, %v124_v54   ;;  %172 = vperm.xlu0 %387, %v121_v53  }
  0xad   :  { %v103_v11 = vpop.permute.xlu1 %102 }
  0xae   :  { %v119_v22 = vmul.f32 %v103_v11, %v58_v3  ;;  %v127_v23 = vmul.f32 %v103_v11, %v62_v16 }
  0xb0   :  { %184 = vperm.xlu0 %387, %v125_v58   ;;  %151 = vperm.xlu1 %388, %v114_v57  }
  0xb4   :  { %163 = vperm.xlu0 %387, %v118_v62   ;;  %175 = vperm.xlu1 %388, %v122_v61  }
  0xb8   :  { %187 = vperm.xlu0 %387, %v126_v10   ;;  %154 = vperm.xlu1 %388, %v115_v7  }
  0xbc   :  { %166 = vperm.xlu0 %387, %v119_v22   ;;  %178 = vperm.xlu1 %388, %v123_v17  }
  0xc0   :  { %190 = vperm.xlu0 %387, %v127_v23  }
 0x11b   :  { %v149_v26 = vpop.permute.xlu1 %148 }
 0x11c   :  { %v146_v27 = vpop.permute.xlu0 %145  ;;  %v202_v45 = vrot.slane %v149_v26, %v201_v39 }
 0x11d   :  { %v197_v46 = vrot.slane %v146_v27, %v196_v40 }
 0x11f   :  { %v158_v28 = vpop.permute.xlu1 %157  ;;  %v204_v53 = vsel %vm203_vm0, %v202_v45, %v197_v46 }
 0x120   :  { %v222_v51 = vrot.slane %v158_v28, %v196_v40 }
 0x123   :  { %v170_v29 = vpop.permute.xlu1 %169  ;;  %v161_v30 = vpop.permute.xlu0 %160 }
 0x124   :  { %v226_v48 = vrot.slane %v161_v30, %v201_v39  ;;  %v241_v54 = vrot.slane %v170_v29, %v196_v40 }
 0x126   :  { %v227_v25 = vsel %vm203_vm0, %v226_v48, %v222_v51 }
 0x127   :  { %v182_v32 = vpop.permute.xlu1 %181  ;;  %v173_v33 = vpop.permute.xlu0 %172 }
 0x128   :  { %v245_v57 = vrot.slane %v173_v33, %v201_v39  ;;  %v260_v3 = vrot.slane %v182_v32, %v196_v40 }
 0x12a   :  { %v246_v22 = vsel %vm203_vm0, %v245_v57, %v241_v54 }
 0x12b   :  { %v152_v35 = vpop.permute.xlu1 %151  ;;  %v185_v36 = vpop.permute.xlu0 %184 }
 0x12c   :  { %v209_v49 = vrot.slane %v152_v35, %v208_v43  ;;  %v264_v58 = vrot.slane %v185_v36, %v201_v39 }
 0x12e   :  { %v211_v60 = vsel %vm210_vm1, %v209_v49, %v204_v53  ;;  %v265_v23 = vsel %vm203_vm0, %v264_v58, %v260_v3 }
 0x12f   :  { %v176_v41 = vpop.permute.xlu1 %175  ;;  %v164_v42 = vpop.permute.xlu0 %163 }
 0x130   :  { %v231_v50 = vrot.slane %v164_v42, %v208_v43  ;;  %v250_v61 = vrot.slane %v176_v41, %v208_v43 }
 0x132   :  { %v232_v62 = vsel %vm210_vm1, %v231_v50, %v227_v25  ;;  %v251_v28 = vsel %vm210_vm1, %v250_v61, %v246_v22 }
 0x133   :  { %v155_v24 = vpop.permute.xlu1 %154  ;;  %v188_v47 = vpop.permute.xlu0 %187 }
 0x134   :  { %v216_v52 = vrot.slane %v155_v24, %v215_v44  ;;  %v269_v63 = vrot.slane %v188_v47, %v208_v43 }
 0x136   :  { %v218_v10 = vsel %vm217_vm2, %v216_v52, %v211_v60  ;;  %v270_v29 = vsel %vm210_vm1, %v269_v63, %v265_v23 }
 0x137   :  { %v179_v55 = vpop.permute.xlu1 %178  ;;  %v167_v56 = vpop.permute.xlu0 %166 }
 0x138   :  { %v236_v59 = vrot.slane %v167_v56, %v215_v44  ;;  %v255_v7 = vrot.slane %v179_v55, %v215_v44 }
 0x13a   :  { %v237_v11 = vsel %vm217_vm2, %v236_v59, %v232_v62  ;;  %v256_v30 = vsel %vm217_vm2, %v255_v7, %v251_v28 }
 0x13b   :  { %v191_v16 = vpop.permute.xlu0 %190  ;;  %v277_v17 = vsel %vm276_vm3, %v237_v11, %v218_v10 }
 0x13c   :  { %v274_v26 = vrot.slane %v191_v16, %v215_v44  ;;  %v282_v27 = vsel %vm281_vm4, %v277_v17, 0.0 }
 0x13d   :  { %283 = vadd.xlane.f32.xlu1 %v282_v27 }
 0x13e   :  { %v275_v31 = vsel %vm217_vm2, %v274_v26, %v270_v29 }
 0x13f   :  { %v278_v32 = vsel %vm276_vm3, %v275_v31, %v256_v30 }
 0x140   :  { %v285_v33 = vsel %vm281_vm4, %v278_v32, 0.0 }
 0x141   :  { %286 = vadd.xlane.f32.xlu0 %v285_v33 }
 0x1c6   :  { %v284_v35 = vpop.xlane.xlu1 %283 }
 0x1c7   :  { %v288_v36 = vmax.f32 %v284_v35, 0.0 }
 0x1c9   :  { %v290_v37 = vmul.f32 %v288_v36, %v64_v34 }
 0x1ca   :  { %v287_v38 = vpop.xlane.xlu0 %286 }
 0x1cb   :  { %v292_v39 = vsel %vm281_vm4, %v290_v37, 0.0  ;;  %v289_v40 = vmax.f32 %v287_v38, 0.0 }
 0x1cc   :  { %v293_v41 = vrot.slane %v292_v39, 4 }
 0x1cd   :  { %v291_v42 = vmul.f32 %v289_v40, %v64_v34 }
 0x1ce   :  { %v294_v43 = vadd.f32 %v293_v41, %v292_v39 }
 0x1cf   :  { %v299_v44 = vsel %vm281_vm4, %v291_v42, 0.0 }
 0x1d0   :  { %v295_v45 = vrot.slane %v294_v43, 2  ;;  %v300_v46 = vrot.slane %v299_v44, 4 }
 0x1d2   :  { %v296_v24 = vadd.f32 %v295_v45, %v294_v43  ;;  %v301_v47 = vadd.f32 %v300_v46, %v299_v44 }
 0x1d4   :  { %v297_v48 = vrot.slane %v296_v24, 1  ;;  %v302_v49 = vrot.slane %v301_v47, 2 }
 0x1d6   :  { %v298_v50 = vadd.f32 %v297_v48, %v296_v24  ;;  %v303_v51 = vadd.f32 %v302_v49, %v301_v47 }
 0x1d8   :  { %v384_v52 = vmul.f32 -1.442695, %v298_v50  ;;  %v304_v53 = vrot.slane %v303_v51, 1 }
 0x1da   :  { %389 = vpow2.f32 %v384_v52  ;;  %v305_v54 = vadd.f32 %v304_v53, %v303_v51 }
 0x1dc   :  { %v385_v55 = vmul.f32 -1.442695, %v305_v54 }
 0x1de   :  { %391 = vpow2.f32 %v385_v55 }
 0x1e7   :  { %v390_v56 = vpop.eup %389 }
 0x1e8   :  { %v312_v25 = vadd.f32 1.0, %v390_v56 }
 0x1ea   :  { %393 = vrcp.f32 %v312_v25 }
 0x1eb   :  { %v392_v57 = vpop.eup %391 }
 0x1ec   :  { %v313_v58 = vadd.f32 1.0, %v392_v57 }
 0x1ee   :  { %395 = vrcp.f32 %v313_v58 }
 0x1f7   :  { %v394_v59 = vpop.eup %393 }
 0x1f8   :  { %323 = vbcast.lane.b32.xlu1 %v394_v59, 264  ;;  %319 = vbcast.lane.b32.xlu0 %v394_v59, 256 }
 0x1fb   :  { %v396_v60 = vpop.eup %395 }
 0x1fc   :  { %327 = vbcast.lane.b32.xlu1 %v394_v59, 272  ;;  %331 = vbcast.lane.b32.xlu0 %v394_v59, 280 }
 0x200   :  { %338 = vbcast.lane.b32.xlu0 %v396_v60, 264  ;;  %334 = vbcast.lane.b32.xlu1 %v396_v60, 256 }
 0x204   :  { %346 = vbcast.lane.b32.xlu0 %v396_v60, 280  ;;  %342 = vbcast.lane.b32.xlu1 %v396_v60, 272 }
 0x26a   :  { %v324_v61 = vpop.permute.xlu1 %323  ;;  %v320_v62 = vpop.permute.xlu0 %319 }
 0x26b   :  { %v350_v63 = vmul.f32 %v324_v61, %v455_v8  ;;  %v351_v3 = vmul.f32 %v324_v61, %v460_v9  ;;  %v348_v7 = vmul.f32 %v320_v62, %v431_v2  ;;  %v349_v10 = vmul.f32 %v320_v62, %v438_v4 }
 0x26d   :  { %366 = vst [vmem:[%s615_s3 + $0x10] sm:$0xff] %v350_v63  ;;  %367 = vst [vmem:[%s615_s3 + $0x18] sm:$0xff] %v351_v3 }
 0x26e   :  { %364 = vst [vmem:[%s615_s3] sm:$0xff] %v348_v7  ;;  %365 = vst [vmem:[%s615_s3 + $0x8] sm:$0xff] %v349_v10  ;;  %v328_v8 = vpop.permute.xlu1 %327  ;;  %v332_v2 = vpop.permute.xlu0 %331 }
 0x26f   :  { %v352_v4 = vmul.f32 %v328_v8, %v479_v14  ;;  %v353_v9 = vmul.f32 %v328_v8, %v484_v15  ;;  %v354_v11 = vmul.f32 %v332_v2, %v503_v20  ;;  %v355_v16 = vmul.f32 %v332_v2, %v508_v21 }
 0x271   :  { %368 = vst [vmem:[%s615_s3 + $0x20] sm:$0xff] %v352_v4  ;;  %369 = vst [vmem:[%s615_s3 + $0x28] sm:$0xff] %v353_v9 }
 0x272   :  { %370 = vst [vmem:[%s615_s3 + $0x30] sm:$0xff] %v354_v11  ;;  %371 = vst [vmem:[%s615_s3 + $0x38] sm:$0xff] %v355_v16  ;;  %v335_v14 = vpop.permute.xlu1 %334  ;;  %v339_v15 = vpop.permute.xlu0 %338 }
 0x273   :  { %v356_v20 = vmul.f32 %v335_v14, %v421_v0  ;;  %v357_v21 = vmul.f32 %v335_v14, %v426_v1  ;;  %v358_v17 = vmul.f32 %v339_v15, %v443_v5  ;;  %v359_v22 = vmul.f32 %v339_v15, %v448_v6 }
 0x275   :  { %372 = vst [vmem:[%s615_s3 + $0x40] sm:$0xff] %v356_v20  ;;  %373 = vst [vmem:[%s615_s3 + $0x48] sm:$0xff] %v357_v21 }
 0x276   :  { %374 = vst [vmem:[%s615_s3 + $0x50] sm:$0xff] %v358_v17  ;;  %375 = vst [vmem:[%s615_s3 + $0x58] sm:$0xff] %v359_v22  ;;  %v343_v0 = vpop.permute.xlu1 %342  ;;  %v347_v1 = vpop.permute.xlu0 %346 }
 0x277   :  { %v360_v5 = vmul.f32 %v343_v0, %v469_v12  ;;  %v361_v6 = vmul.f32 %v343_v0, %v474_v13  ;;  %v362_v23 = vmul.f32 %v347_v1, %v493_v18  ;;  %v363_v26 = vmul.f32 %v347_v1, %v498_v19 }
 0x279   :  { %376 = vst [vmem:[%s615_s3 + $0x60] sm:$0xff] %v360_v5  ;;  %377 = vst [vmem:[%s615_s3 + $0x68] sm:$0xff] %v361_v6 }
 0x27a   :  { %378 = vst [vmem:[%s615_s3 + $0x70] sm:$0xff] %v362_v23  ;;  %379 = vst [vmem:[%s615_s3 + $0x78] sm:$0xff] %v363_v26 }

</bundles_post_ra>
